<compile_context>
chip_gen: v5e
topology: v5e:2x2
jax: 0.10.0
libtpu: 0.0.40
codegen_flags: <defaults>
</compile_context>

<pallas_src>
import math
import functools

import jax
import jax.numpy as jnp
from jax import lax
from jax.experimental import pallas as pl
from jax.experimental.pallas import tpu as pltpu

# ---------------- synthetic config (small, consistent with the module) -------
N_IMG = 8          # x.size(0): number of images for the patient
C_FEAT = 8         # channels == cfg['feature_dim'] of the stand-in backbone
H_IMG = W_IMG = 16
LATENT = 32        # cfg['latent_att']
HEAD_1 = 4         # cfg['head_1'] (irrelevant: seq-len-1 self-attention)
HEAD_2 = 2         # cfg['head_2']  (4 % head_2 == 0)
T_TAB = 8          # rows of tabular data x_tab (embed dim 4)

# ---- small-parameter block layout (rows relative to C*H*W inside the slab) --
# Every matrix block starts on a sublane-tile (multiple-of-8) row boundary.
ROW_WQ = 0      # rows 0:4   w_in2[0:4].T   (4,4)
ROW_WK = 8      # rows 8:12  w_in2[4:8].T   (4,4)
ROW_WV = 16     # rows 16:20 w_in2[8:12].T  (4,4)
ROW_WTAIL = 24  # rows 24:28 (w_p2 @ w_out2).T padded to (4,4)
ROW_BQ = 32
ROW_BK = 33
ROW_BV = 34
ROW_B1 = 35     # folded pre-GELU bias
ROW_BTAIL = 36  # folded tail bias, padded to 4 lanes
SLAB_ROWS = 40  # multiple of 8


def _gelu_exact(x):
    # torch.nn.functional.gelu default = exact erf formulation
    return 0.5 * x * (1.0 + lax.erf(x / jnp.sqrt(jnp.asarray(2.0, x.dtype))))


def patient_kernel(x_ref, xtab_ref, w_ref, out_ref, *, num_heads_2):
    f32 = jnp.float32
    chw = x_ref.shape[1]                                    # static at trace time

    # ---- one tiny load of the packed small-parameter block ------------------
    slab = w_ref[chw:chw + SLAB_ROWS, :]                    # (40, 4)
    wq = slab[ROW_WQ:ROW_WQ + 4, :]
    wk = slab[ROW_WK:ROW_WK + 4, :]
    wv = slab[ROW_WV:ROW_WV + 4, :]
    wtail = slab[ROW_WTAIL:ROW_WTAIL + 4, :]
    bq = slab[ROW_BQ:ROW_BQ + 1, :]
    bk = slab[ROW_BK:ROW_BK + 1, :]
    bv = slab[ROW_BV:ROW_BV + 1, :]
    b1 = slab[ROW_B1:ROW_B1 + 1, :]
    btail = slab[ROW_BTAIL:ROW_BTAIL + 1, :]

    # ---- folded: GAP + head + seq-len-1 self-attn + proj_1 (pre-GELU) -------
    # x_ref: (N, C*H*W) lane-dense; w_ref[:chw]: (C*H*W, 4) pre-folded.
    p1 = jnp.dot(x_ref[...], w_ref[0:chw, :],
                 preferred_element_type=f32) + b1                       # (N, 4)
    p1 = _gelu_exact(p1)

    # ---- multihead_attn_2: query = x_tab (T,4), key/value = p1 (N,4) --------
    q = jnp.dot(xtab_ref[...], wq, preferred_element_type=f32) + bq    # (T, 4)
    k = jnp.dot(p1, wk, preferred_element_type=f32) + bk               # (N, 4)
    v = jnp.dot(p1, wv, preferred_element_type=f32) + bv               # (N, 4)

    dh = 4 // num_heads_2
    scale = 1.0 / math.sqrt(dh)
    col = lax.broadcasted_iota(jnp.int32, (1, 4), 1)
    attn2 = jnp.zeros(q.shape, f32)
    for h in range(num_heads_2):                                       # static
        # Lane mask selecting this head's channels; zeroed lanes contribute 0
        # to the dot products, so this is exactly per-head attention.
        mask = ((col >= h * dh) & (col < (h + 1) * dh)).astype(f32)    # (1, 4)
        qh = q * mask
        kh = k * mask
        vh = v * mask
        scores = lax.dot_general(qh, kh, (((1,), (1,)), ((), ())),
                                 preferred_element_type=f32) * scale   # (T, N)
        probs = jax.nn.softmax(scores, axis=-1)
        attn2 = attn2 + jnp.dot(probs, vh, preferred_element_type=f32)  # (T, 4)

    # ---- folded tail: mean over T commutes with out_proj and proj_2 ---------
    m = jnp.mean(attn2, axis=0, keepdims=True)                         # (1, 4)
    res = jnp.dot(m, wtail, preferred_element_type=f32) + btail        # (1, 4)
    out_ref[...] = res[:, :2]                                          # (1, 2)


def fold_weights(params, c, hw):
    """Fold all linear chains into one (C*HW + 40, 4) weights slab."""
    hp = lax.Precision.HIGHEST
    f32 = jnp.float32
    E = LATENT
    w_v1 = params["w_in1"][2 * E:3 * E, :]
    b_v1 = params["b_in1"][2 * E:3 * E]

    # Fold GAP -> head -> (seq-len-1 attention == out_proj(V)) -> proj_1.
    w_fold = jnp.dot(params["w_p1"],
                     jnp.dot(params["w_out1"],
                             jnp.dot(w_v1, params["w_head"], precision=hp),
                             precision=hp),
                     precision=hp)                                     # (4, C)
    b_fold = (jnp.dot(
        jnp.dot(
            jnp.dot(params["b_head"], w_v1.T, precision=hp) + b_v1,
            params["w_out1"].T, precision=hp) + params["b_out1"],
        params["w_p1"].T, precision=hp) + params["b_p1"])              # (4,)
    # GAP folded into the matmul weight: (C*HW, 4)
    w_big = jnp.repeat(w_fold.T, hw, axis=0) / hw

    # Tail fold: mean over T commutes with out_proj (w_out2) and proj_2 (w_p2)
    w_tail = jnp.dot(params["w_p2"], params["w_out2"], precision=hp)   # (2, 4)
    b_tail = jnp.dot(params["w_p2"], params["b_out2"], precision=hp) + params["b_p2"]

    w_in2, b_in2 = params["w_in2"], params["b_in2"]
    z44 = jnp.zeros((4, 4), f32)
    slab = jnp.concatenate([
        w_in2[0:4].T, z44,                                             # rows  0:8
        w_in2[4:8].T, z44,                                             # rows  8:16
        w_in2[8:12].T, z44,                                            # rows 16:24
        jnp.concatenate([w_tail.T, jnp.zeros((4, 2), f32)], axis=1), z44,  # 24:32
        b_in2[0:4][None, :],                                           # row 32
        b_in2[4:8][None, :],                                           # row 33
        b_in2[8:12][None, :],                                          # row 34
        b_fold[None, :],                                               # row 35
        jnp.concatenate([b_tail, jnp.zeros((2,), f32)])[None, :],      # row 36
        jnp.zeros((3, 4), f32),                                        # rows 37:40
    ], axis=0).astype(f32)                                             # (40, 4)

    return jnp.concatenate([w_big.astype(f32), slab], axis=0)          # (C*HW+40, 4)


def patient_model_forward(x_nchw, x_tab, params):
    """Wrapper: fold linear chains, pack params, single pallas_call."""
    n, c, h, w = x_nchw.shape
    hw = h * w
    x2d = x_nchw.reshape(n, c * hw)                                    # lane-dense
    weights = fold_weights(params, c, hw)                              # (c*hw+40, 4)

    out = pl.pallas_call(
        functools.partial(patient_kernel, num_heads_2=HEAD_2),
        out_shape=jax.ShapeDtypeStruct((1, 2), jnp.float32),
        in_specs=[pl.BlockSpec(memory_space=pltpu.MemorySpace.VMEM)] * 3,
        out_specs=pl.BlockSpec(memory_space=pltpu.MemorySpace.VMEM),
    )(x2d, x_tab, weights)
    return out[0]                                                      # (2,)


def reference_forward(x_nchw, x_tab, params):
    """Pure-JAX reference replicating the PyTorch forward semantics (unfused)."""
    mm = functools.partial(jnp.dot, precision=lax.Precision.HIGHEST)
    # TODO(synk): pretrained DINOv2/timm trunk not reproducible here; backbone
    # stand-in = GAP + the module-owned head Linear(feature_dim, latent_att).
    gap = jnp.mean(x_nchw, axis=(2, 3))                                # (N, C)
    feats = mm(gap, params["w_head"].T) + params["b_head"]             # (N, E)

    E = LATENT
    w_v1 = params["w_in1"][2 * E:3 * E, :]
    b_v1 = params["b_in1"][2 * E:3 * E]
    # seq-len 1 => softmax over single key == 1 => attention = out_proj(V)
    attn1 = mm(mm(feats, w_v1.T) + b_v1, params["w_out1"].T) + params["b_out1"]

    p1 = mm(attn1, params["w_p1"].T) + params["b_p1"]
    p1 = 0.5 * p1 * (1.0 + lax.erf(p1 / jnp.sqrt(2.0)))

    w_in2, b_in2 = params["w_in2"], params["b_in2"]
    q = mm(x_tab, w_in2[0:4].T) + b_in2[0:4]
    k = mm(p1, w_in2[4:8].T) + b_in2[4:8]
    v = mm(p1, w_in2[8:12].T) + b_in2[8:12]
    dh = 4 // HEAD_2
    outs = []
    for h in range(HEAD_2):
        qh, kh, vh = (a[:, h * dh:(h + 1) * dh] for a in (q, k, v))
        probs = jax.nn.softmax(mm(qh, kh.T) / math.sqrt(dh), axis=-1)
        outs.append(mm(probs, vh))
    attn2 = mm(jnp.concatenate(outs, axis=-1), params["w_out2"].T) + params["b_out2"]
    p2 = mm(attn2, params["w_p2"].T) + params["b_p2"]
    # TODO(synk): `aggregation()` helper is not given in the source; mean over T.
    return jnp.mean(p2, axis=0)                                        # (2,)


def init_params(key):
    ks = jax.random.split(key, 16)
    s = 0.1
    return {
        "w_head": s * jax.random.normal(ks[0], (LATENT, C_FEAT), jnp.float32),
        "b_head": s * jax.random.normal(ks[1], (LATENT,), jnp.float32),
        "w_in1": s * jax.random.normal(ks[2], (3 * LATENT, LATENT), jnp.float32),
        "b_in1": s * jax.random.normal(ks[3], (3 * LATENT,), jnp.float32),
        "w_out1": s * jax.random.normal(ks[4], (LATENT, LATENT), jnp.float32),
        "b_out1": s * jax.random.normal(ks[5], (LATENT,), jnp.float32),
        "w_p1": s * jax.random.normal(ks[6], (4, LATENT), jnp.float32),
        "b_p1": s * jax.random.normal(ks[7], (4,), jnp.float32),
        "w_in2": s * jax.random.normal(ks[8], (12, 4), jnp.float32),
        "b_in2": s * jax.random.normal(ks[9], (12,), jnp.float32),
        "w_out2": s * jax.random.normal(ks[10], (4, 4), jnp.float32),
        "b_out2": s * jax.random.normal(ks[11], (4,), jnp.float32),
        "w_p2": s * jax.random.normal(ks[12], (2, 4), jnp.float32),
        "b_p2": s * jax.random.normal(ks[13], (2,), jnp.float32),
    }


if __name__ == "__main__":
    key = jax.random.PRNGKey(0)
    k_params, k_x, k_tab = jax.random.split(key, 3)

    params = init_params(k_params)
    x = jax.random.normal(k_x, (N_IMG, C_FEAT, H_IMG, W_IMG), jnp.float32)   # NCHW
    x_tab = jax.random.normal(k_tab, (T_TAB, 4), jnp.float32)

    forward = jax.jit(patient_model_forward)
    out = forward(x, x_tab, params)
    out = jax.block_until_ready(out)

    ref = reference_forward(x, x_tab, params)
    assert out.shape == (2,)
    assert jnp.allclose(out, ref, rtol=1e-3, atol=1e-3), (out, ref)

    print("KERNEL_OK")
</pallas_src>

<mosaic_0001>
module attributes {stable_mosaic.version = 11 : i64} {
  func.func @patient_kernel(%arg0: memref<8x2048xf32, #tpu.memory_space<vmem>>, %arg1: memref<8x4xf32, #tpu.memory_space<vmem>>, %arg2: memref<2088x4xf32, #tpu.memory_space<vmem>>, %arg3: memref<1x2xf32, #tpu.memory_space<vmem>>) attributes {dimension_semantics = [], scalar_prefetch = 0 : i64, scratch_operands = 0 : i64, tpu.core_type = #tpu.core_type<tc>} {
    %c2048 = arith.constant 2048 : index
    %c0 = arith.constant 0 : index
    %0 = vector.load %arg2[%c2048, %c0] : memref<2088x4xf32, #tpu.memory_space<vmem>>, vector<40x4xf32>
    %1 = vector.extract_strided_slice %0 {offsets = [0, 0], sizes = [4, 4], strides = [1, 1]} : vector<40x4xf32> to vector<4x4xf32>
    %2 = vector.extract_strided_slice %0 {offsets = [8, 0], sizes = [4, 4], strides = [1, 1]} : vector<40x4xf32> to vector<4x4xf32>
    %3 = vector.extract_strided_slice %0 {offsets = [16, 0], sizes = [4, 4], strides = [1, 1]} : vector<40x4xf32> to vector<4x4xf32>
    %4 = vector.extract_strided_slice %0 {offsets = [24, 0], sizes = [4, 4], strides = [1, 1]} : vector<40x4xf32> to vector<4x4xf32>
    %5 = vector.extract_strided_slice %0 {offsets = [32, 0], sizes = [1, 4], strides = [1, 1]} : vector<40x4xf32> to vector<1x4xf32>
    %6 = vector.extract_strided_slice %0 {offsets = [33, 0], sizes = [1, 4], strides = [1, 1]} : vector<40x4xf32> to vector<1x4xf32>
    %7 = vector.extract_strided_slice %0 {offsets = [34, 0], sizes = [1, 4], strides = [1, 1]} : vector<40x4xf32> to vector<1x4xf32>
    %8 = vector.extract_strided_slice %0 {offsets = [35, 0], sizes = [1, 4], strides = [1, 1]} : vector<40x4xf32> to vector<1x4xf32>
    %9 = vector.extract_strided_slice %0 {offsets = [36, 0], sizes = [1, 4], strides = [1, 1]} : vector<40x4xf32> to vector<1x4xf32>
    %c0_0 = arith.constant 0 : index
    %c0_1 = arith.constant 0 : index
    %10 = vector.load %arg0[%c0_0, %c0_1] : memref<8x2048xf32, #tpu.memory_space<vmem>>, vector<8x2048xf32>
    %c0_2 = arith.constant 0 : index
    %c0_3 = arith.constant 0 : index
    %11 = vector.load %arg2[%c0_2, %c0_3] : memref<2088x4xf32, #tpu.memory_space<vmem>>, vector<2048x4xf32>
    %cst = arith.constant dense<0.000000e+00> : vector<8x4xf32>
    %12 = tpu.matmul %10, %11, %cst {dimension_numbers = #tpu.dot_dimension_numbers<[1], [0], [0], [1], [0, 0, 1, 1], [], []>} : vector<8x2048xf32>, vector<2048x4xf32>, vector<8x4xf32> -> vector<8x4xf32>
    %13 = vector.broadcast %8 : vector<1x4xf32> to vector<8x4xf32>
    %14 = arith.addf %12, %13 : vector<8x4xf32>
    %cst_4 = arith.constant 5.000000e-01 : f32
    %15 = vector.broadcast %cst_4 : f32 to vector<8x4xf32>
    %16 = arith.mulf %15, %14 : vector<8x4xf32>
    %cst_5 = arith.constant 2.000000e+00 : f32
    %17 = math.sqrt %cst_5 : f32
    %18 = vector.broadcast %17 : f32 to vector<8x4xf32>
    %19 = arith.divf %14, %18 : vector<8x4xf32>
    %20 = math.erf %19 : vector<8x4xf32>
    %cst_6 = arith.constant 1.000000e+00 : f32
    %21 = vector.broadcast %cst_6 : f32 to vector<8x4xf32>
    %22 = arith.addf %21, %20 : vector<8x4xf32>
    %23 = arith.mulf %16, %22 : vector<8x4xf32>
    %c0_7 = arith.constant 0 : index
    %c0_8 = arith.constant 0 : index
    %24 = vector.load %arg1[%c0_7, %c0_8] : memref<8x4xf32, #tpu.memory_space<vmem>>, vector<8x4xf32>
    %cst_9 = arith.constant dense<0.000000e+00> : vector<8x4xf32>
    %25 = tpu.matmul %24, %1, %cst_9 {dimension_numbers = #tpu.dot_dimension_numbers<[1], [0], [0], [1], [0, 0, 1, 1], [], []>} : vector<8x4xf32>, vector<4x4xf32>, vector<8x4xf32> -> vector<8x4xf32>
    %26 = vector.broadcast %5 : vector<1x4xf32> to vector<8x4xf32>
    %27 = arith.addf %25, %26 : vector<8x4xf32>
    %cst_10 = arith.constant dense<0.000000e+00> : vector<8x4xf32>
    %28 = tpu.matmul %23, %2, %cst_10 {dimension_numbers = #tpu.dot_dimension_numbers<[1], [0], [0], [1], [0, 0, 1, 1], [], []>} : vector<8x4xf32>, vector<4x4xf32>, vector<8x4xf32> -> vector<8x4xf32>
    %29 = vector.broadcast %6 : vector<1x4xf32> to vector<8x4xf32>
    %30 = arith.addf %28, %29 : vector<8x4xf32>
    %cst_11 = arith.constant dense<0.000000e+00> : vector<8x4xf32>
    %31 = tpu.matmul %23, %3, %cst_11 {dimension_numbers = #tpu.dot_dimension_numbers<[1], [0], [0], [1], [0, 0, 1, 1], [], []>} : vector<8x4xf32>, vector<4x4xf32>, vector<8x4xf32> -> vector<8x4xf32>
    %32 = vector.broadcast %7 : vector<1x4xf32> to vector<8x4xf32>
    %33 = arith.addf %31, %32 : vector<8x4xf32>
    %34 = tpu.iota {dimensions = array<i32: 1>} : vector<1x4xi32>
    %cst_12 = arith.constant 0.000000e+00 : f32
    %35 = vector.broadcast %cst_12 : f32 to vector<8x4xf32>
    %c0_i32 = arith.constant 0 : i32
    %36 = vector.broadcast %c0_i32 : i32 to vector<1x4xi32>
    %37 = arith.cmpi sge, %34, %36 : vector<1x4xi32>
    %c2_i32 = arith.constant 2 : i32
    %38 = vector.broadcast %c2_i32 : i32 to vector<1x4xi32>
    %39 = arith.cmpi slt, %34, %38 : vector<1x4xi32>
    %40 = arith.andi %37, %39 : vector<1x4xi1>
    %41 = arith.extui %40 : vector<1x4xi1> to vector<1x4xi32>
    %42 = arith.sitofp %41 : vector<1x4xi32> to vector<1x4xf32>
    %43 = vector.broadcast %42 : vector<1x4xf32> to vector<8x4xf32>
    %44 = arith.mulf %27, %43 : vector<8x4xf32>
    %45 = vector.broadcast %42 : vector<1x4xf32> to vector<8x4xf32>
    %46 = arith.mulf %30, %45 : vector<8x4xf32>
    %47 = vector.broadcast %42 : vector<1x4xf32> to vector<8x4xf32>
    %48 = arith.mulf %33, %47 : vector<8x4xf32>
    %cst_13 = arith.constant dense<0.000000e+00> : vector<8x8xf32>
    %49 = tpu.matmul %44, %46, %cst_13 {dimension_numbers = #tpu.dot_dimension_numbers<[1], [1], [0], [0], [0, 0, 1, 0], [], []>} : vector<8x4xf32>, vector<8x4xf32>, vector<8x8xf32> -> vector<8x8xf32>
    %cst_14 = arith.constant 0.707106769 : f32
    %50 = vector.broadcast %cst_14 : f32 to vector<8x8xf32>
    %51 = arith.mulf %49, %50 : vector<8x8xf32>
    %cst_15 = arith.constant dense<0xFF800000> : vector<8xf32>
    %52 = vector.multi_reduction <maximumf>, %51, %cst_15 [1] : vector<8x8xf32> to vector<8xf32>
    %cst_16 = arith.constant 0xFF800000 : f32
    %53 = vector.broadcast %cst_16 : f32 to vector<8xf32>
    %54 = arith.maximumf %53, %52 : vector<8xf32>
    %55 = vector.shape_cast %54 : vector<8xf32> to vector<8x1xf32>
    %56 = vector.broadcast %55 : vector<8x1xf32> to vector<8x8xf32>
    %57 = arith.subf %51, %56 : vector<8x8xf32>
    %58 = math.exp %57 : vector<8x8xf32>
    %cst_17 = arith.constant dense<0.000000e+00> : vector<8xf32>
    %59 = vector.multi_reduction <add>, %58, %cst_17 [1] : vector<8x8xf32> to vector<8xf32>
    %60 = vector.shape_cast %59 : vector<8xf32> to vector<8x1xf32>
    %61 = vector.broadcast %60 : vector<8x1xf32> to vector<8x8xf32>
    %62 = arith.divf %58, %61 : vector<8x8xf32>
    %cst_18 = arith.constant dense<0.000000e+00> : vector<8x4xf32>
    %63 = tpu.matmul %62, %48, %cst_18 {dimension_numbers = #tpu.dot_dimension_numbers<[1], [0], [0], [1], [0, 0, 1, 1], [], []>} : vector<8x8xf32>, vector<8x4xf32>, vector<8x4xf32> -> vector<8x4xf32>
    %64 = arith.addf %35, %63 : vector<8x4xf32>
    %c2_i32_19 = arith.constant 2 : i32
    %65 = vector.broadcast %c2_i32_19 : i32 to vector<1x4xi32>
    %66 = arith.cmpi sge, %34, %65 : vector<1x4xi32>
    %c4_i32 = arith.constant 4 : i32
    %67 = vector.broadcast %c4_i32 : i32 to vector<1x4xi32>
    %68 = arith.cmpi slt, %34, %67 : vector<1x4xi32>
    %69 = arith.andi %66, %68 : vector<1x4xi1>
    %70 = arith.extui %69 : vector<1x4xi1> to vector<1x4xi32>
    %71 = arith.sitofp %70 : vector<1x4xi32> to vector<1x4xf32>
    %72 = vector.broadcast %71 : vector<1x4xf32> to vector<8x4xf32>
    %73 = arith.mulf %27, %72 : vector<8x4xf32>
    %74 = vector.broadcast %71 : vector<1x4xf32> to vector<8x4xf32>
    %75 = arith.mulf %30, %74 : vector<8x4xf32>
    %76 = vector.broadcast %71 : vector<1x4xf32> to vector<8x4xf32>
    %77 = arith.mulf %33, %76 : vector<8x4xf32>
    %cst_20 = arith.constant dense<0.000000e+00> : vector<8x8xf32>
    %78 = tpu.matmul %73, %75, %cst_20 {dimension_numbers = #tpu.dot_dimension_numbers<[1], [1], [0], [0], [0, 0, 1, 0], [], []>} : vector<8x4xf32>, vector<8x4xf32>, vector<8x8xf32> -> vector<8x8xf32>
    %cst_21 = arith.constant 0.707106769 : f32
    %79 = vector.broadcast %cst_21 : f32 to vector<8x8xf32>
    %80 = arith.mulf %78, %79 : vector<8x8xf32>
    %cst_22 = arith.constant dense<0xFF800000> : vector<8xf32>
    %81 = vector.multi_reduction <maximumf>, %80, %cst_22 [1] : vector<8x8xf32> to vector<8xf32>
    %cst_23 = arith.constant 0xFF800000 : f32
    %82 = vector.broadcast %cst_23 : f32 to vector<8xf32>
    %83 = arith.maximumf %82, %81 : vector<8xf32>
    %84 = vector.shape_cast %83 : vector<8xf32> to vector<8x1xf32>
    %85 = vector.broadcast %84 : vector<8x1xf32> to vector<8x8xf32>
    %86 = arith.subf %80, %85 : vector<8x8xf32>
    %87 = math.exp %86 : vector<8x8xf32>
    %cst_24 = arith.constant dense<0.000000e+00> : vector<8xf32>
    %88 = vector.multi_reduction <add>, %87, %cst_24 [1] : vector<8x8xf32> to vector<8xf32>
    %89 = vector.shape_cast %88 : vector<8xf32> to vector<8x1xf32>
    %90 = vector.broadcast %89 : vector<8x1xf32> to vector<8x8xf32>
    %91 = arith.divf %87, %90 : vector<8x8xf32>
    %cst_25 = arith.constant dense<0.000000e+00> : vector<8x4xf32>
    %92 = tpu.matmul %91, %77, %cst_25 {dimension_numbers = #tpu.dot_dimension_numbers<[1], [0], [0], [1], [0, 0, 1, 1], [], []>} : vector<8x8xf32>, vector<8x4xf32>, vector<8x4xf32> -> vector<8x4xf32>
    %93 = arith.addf %64, %92 : vector<8x4xf32>
    %cst_26 = arith.constant dense<0.000000e+00> : vector<4xf32>
    %94 = vector.multi_reduction <add>, %93, %cst_26 [0] : vector<8x4xf32> to vector<4xf32>
    %95 = vector.shape_cast %94 : vector<4xf32> to vector<1x4xf32>
    %cst_27 = arith.constant 8.000000e+00 : f32
    %96 = vector.broadcast %cst_27 : f32 to vector<1x4xf32>
    %97 = arith.divf %95, %96 : vector<1x4xf32>
    %cst_28 = arith.constant dense<0.000000e+00> : vector<1x4xf32>
    %98 = tpu.matmul %97, %4, %cst_28 {dimension_numbers = #tpu.dot_dimension_numbers<[1], [0], [0], [1], [0, 0, 1, 1], [], []>} : vector<1x4xf32>, vector<4x4xf32>, vector<1x4xf32> -> vector<1x4xf32>
    %99 = arith.addf %98, %9 : vector<1x4xf32>
    %100 = vector.extract_strided_slice %99 {offsets = [0, 0], sizes = [1, 2], strides = [1, 1]} : vector<1x4xf32> to vector<1x2xf32>
    %c0_29 = arith.constant 0 : index
    %c0_30 = arith.constant 0 : index
    %101 = vector.load %arg3[%c0_29, %c0_30] : memref<1x2xf32, #tpu.memory_space<vmem>>, vector<1x2xf32>
    tpu.vector_store %arg3[%c0_29, %c0_30], %100 {strides = array<i32>} : memref<1x2xf32, #tpu.memory_space<vmem>>, vector<1x2xf32>,
    return
  }
}

</mosaic_0001>

<bundles_post_ra>
// kernel: patient_model_forward.1
= control target key start
LH: loop header
LB: loop body
LE: loop exit
PB: predicated region body
PF: predicated region fallthrough
CT: control target
= control target key end

     0   :  { %s1922_s0 = inlined_call_operand.vmem [shape: f32[8,2048], index: 0, kind: input, shape index: {}]   ;;  %s1923_s1 = inlined_call_operand.vmem [shape: f32[8,4], index: 1, kind: input, shape index: {}]   ;;  %s1924_s2 = inlined_call_operand.vmem [shape: f32[2088,4], index: 2, kind: input, shape index: {}]   ;;  %s1925_s3 = inlined_call_operand.hbm [shape: f32[1,2], index: 3, kind: output, shape index: {}]  }
   0x1   :  { %v51_v0 = vld [vmem:[%s1924_s2 + $0x78] sm:$0xff]  ;;  %v50_v2 = vld [vmem:[%s1924_s2 + $0x70] sm:$0xff]  ;;  %v49_v6 = vld [vmem:[%s1924_s2 + $0x68] sm:$0xff] }
   0x2   :  { %v83_v1 = vld [vmem:[%s1924_s2 + $0x178] sm:$0xff]  ;;  %293 = vmatpush.msra.mxu0 %v51_v0  ;;  %v82_v4 = vld [vmem:[%s1924_s2 + $0x170] sm:$0xff]  ;;  %v81_v8 = vld [vmem:[%s1924_s2 + $0x168] sm:$0xff] }
   0x3   :  { %333 = vmatpush.msra.mxu2 %v83_v1  ;;  %v67_v3 = vld [vmem:[%s1924_s2 + $0xf8] sm:$0xff]  ;;  %v66_v7 = vld [vmem:[%s1924_s2 + $0xf0] sm:$0xff]  ;;  %v65_v10 = vld [vmem:[%s1924_s2 + $0xe8] sm:$0xff] }
   0x4   :  { %v99_v5 = vld [vmem:[%s1924_s2 + $0x1f8] sm:$0xff]  ;;  %313 = vmatpush.msra.mxu1 %v67_v3  ;;  %294 = vmatpush.msra.mxu0 %v50_v2  ;;  %v98_v9 = vld [vmem:[%s1924_s2 + $0x1f0] sm:$0xff]  ;;  %v48_v11 = vld [vmem:[%s1924_s2 + $0x60] sm:$0xff] }
   0x5   :  { %353 = vmatpush.msra.mxu3 %v99_v5  ;;  %334 = vmatpush.msra.mxu2 %v82_v4  ;;  %v80_v12 = vld [vmem:[%s1924_s2 + $0x160] sm:$0xff]  ;;  %v97_v13 = vld [vmem:[%s1924_s2 + $0x1e8] sm:$0xff]  ;;  %v47_v16 = vld [vmem:[%s1924_s2 + $0x58] sm:$0xff] }
   0x6   :  { %314 = vmatpush.msra.mxu1 %v66_v7  ;;  %295 = vmatpush.msra.mxu0 %v49_v6  ;;  %v64_v14 = vld [vmem:[%s1924_s2 + $0xe0] sm:$0xff]  ;;  %v79_v17 = vld [vmem:[%s1924_s2 + $0x158] sm:$0xff]  ;;  %v46_v20 = vld [vmem:[%s1924_s2 + $0x50] sm:$0xff] }
   0x7   :  { %354 = vmatpush.msra.mxu3 %v98_v9  ;;  %335 = vmatpush.msra.mxu2 %v81_v8  ;;  %v96_v15 = vld [vmem:[%s1924_s2 + $0x1e0] sm:$0xff]  ;;  %v63_v18 = vld [vmem:[%s1924_s2 + $0xd8] sm:$0xff]  ;;  %v78_v21 = vld [vmem:[%s1924_s2 + $0x150] sm:$0xff] }
   0x8   :  { %315 = vmatpush.msra.mxu1 %v65_v10  ;;  %296 = vmatpush.msra.mxu0 %v48_v11  ;;  %v95_v19 = vld [vmem:[%s1924_s2 + $0x1d8] sm:$0xff]  ;;  %v62_v22 = vld [vmem:[%s1924_s2 + $0xd0] sm:$0xff]  ;;  %v45_v24 = vld [vmem:[%s1924_s2 + $0x48] sm:$0xff] }
   0x9   :  { %355 = vmatpush.msra.mxu3 %v97_v13  ;;  %336 = vmatpush.msra.mxu2 %v80_v12  ;;  %v94_v23 = vld [vmem:[%s1924_s2 + $0x1d0] sm:$0xff]  ;;  %v77_v25 = vld [vmem:[%s1924_s2 + $0x148] sm:$0xff]  ;;  %v44_v28 = vld [vmem:[%s1924_s2 + $0x40] sm:$0xff] }
   0xa   :  { %316 = vmatpush.msra.mxu1 %v64_v14  ;;  %297 = vmatpush.msra.mxu0 %v47_v16  ;;  %v61_v26 = vld [vmem:[%s1924_s2 + $0xc8] sm:$0xff]  ;;  %v76_v29 = vld [vmem:[%s1924_s2 + $0x140] sm:$0xff]  ;;  %v43_v32 = vld [vmem:[%s1924_s2 + $0x38] sm:$0xff] }
   0xb   :  { %356 = vmatpush.msra.mxu3 %v96_v15  ;;  %337 = vmatpush.msra.mxu2 %v79_v17  ;;  %v93_v27 = vld [vmem:[%s1924_s2 + $0x1c8] sm:$0xff]  ;;  %v60_v30 = vld [vmem:[%s1924_s2 + $0xc0] sm:$0xff]  ;;  %v75_v33 = vld [vmem:[%s1924_s2 + $0x138] sm:$0xff] }
   0xc   :  { %317 = vmatpush.msra.mxu1 %v63_v18  ;;  %298 = vmatpush.msra.mxu0 %v46_v20  ;;  %v92_v31 = vld [vmem:[%s1924_s2 + $0x1c0] sm:$0xff]  ;;  %v59_v34 = vld [vmem:[%s1924_s2 + $0xb8] sm:$0xff]  ;;  %v42_v36 = vld [vmem:[%s1924_s2 + $0x30] sm:$0xff] }
   0xd   :  { %357 = vmatpush.msra.mxu3 %v95_v19  ;;  %338 = vmatpush.msra.mxu2 %v78_v21  ;;  %v91_v35 = vld [vmem:[%s1924_s2 + $0x1b8] sm:$0xff]  ;;  %v74_v37 = vld [vmem:[%s1924_s2 + $0x130] sm:$0xff]  ;;  %v41_v40 = vld [vmem:[%s1924_s2 + $0x28] sm:$0xff] }
   0xe   :  { %318 = vmatpush.msra.mxu1 %v62_v22  ;;  %299 = vmatpush.msra.mxu0 %v45_v24  ;;  %v58_v38 = vld [vmem:[%s1924_s2 + $0xb0] sm:$0xff]  ;;  %v73_v41 = vld [vmem:[%s1924_s2 + $0x128] sm:$0xff]  ;;  %v40_v44 = vld [vmem:[%s1924_s2 + $0x20] sm:$0xff] }
   0xf   :  { %358 = vmatpush.msra.mxu3 %v94_v23  ;;  %339 = vmatpush.msra.mxu2 %v77_v25  ;;  %v90_v39 = vld [vmem:[%s1924_s2 + $0x1b0] sm:$0xff]  ;;  %v57_v42 = vld [vmem:[%s1924_s2 + $0xa8] sm:$0xff]  ;;  %v72_v45 = vld [vmem:[%s1924_s2 + $0x120] sm:$0xff] }
  0x10   :  { %319 = vmatpush.msra.mxu1 %v61_v26  ;;  %300 = vmatpush.msra.mxu0 %v44_v28  ;;  %v89_v43 = vld [vmem:[%s1924_s2 + $0x1a8] sm:$0xff]  ;;  %v56_v46 = vld [vmem:[%s1924_s2 + $0xa0] sm:$0xff]  ;;  %v39_v48 = vld [vmem:[%s1924_s2 + $0x18] sm:$0xff] }
  0x11   :  { %359 = vmatpush.msra.mxu3 %v93_v27  ;;  %340 = vmatpush.msra.mxu2 %v76_v29  ;;  %v88_v47 = vld [vmem:[%s1924_s2 + $0x1a0] sm:$0xff]  ;;  %v71_v49 = vld [vmem:[%s1924_s2 + $0x118] sm:$0xff]  ;;  %v38_v52 = vld [vmem:[%s1924_s2 + $0x10] sm:$0xff] }
  0x12   :  { %320 = vmatpush.msra.mxu1 %v60_v30  ;;  %301 = vmatpush.msra.mxu0 %v43_v32  ;;  %v55_v50 = vld [vmem:[%s1924_s2 + $0x98] sm:$0xff]  ;;  %v70_v53 = vld [vmem:[%s1924_s2 + $0x110] sm:$0xff]  ;;  %v37_v56 = vld [vmem:[%s1924_s2 + $0x8] sm:$0xff] }
  0x13   :  { %360 = vmatpush.msra.mxu3 %v92_v31  ;;  %341 = vmatpush.msra.mxu2 %v75_v33  ;;  %v87_v51 = vld [vmem:[%s1924_s2 + $0x198] sm:$0xff]  ;;  %v54_v54 = vld [vmem:[%s1924_s2 + $0x90] sm:$0xff]  ;;  %v69_v57 = vld [vmem:[%s1924_s2 + $0x108] sm:$0xff] }
  0x14   :  { %321 = vmatpush.msra.mxu1 %v59_v34  ;;  %302 = vmatpush.msra.mxu0 %v42_v36  ;;  %v86_v55 = vld [vmem:[%s1924_s2 + $0x190] sm:$0xff]  ;;  %v53_v58 = vld [vmem:[%s1924_s2 + $0x88] sm:$0xff]  ;;  %v36_v60 = vld [vmem:[%s1924_s2] sm:$0xff] }
  0x15   :  { %361 = vmatpush.msra.mxu3 %v91_v35  ;;  %342 = vmatpush.msra.mxu2 %v74_v37  ;;  %v85_v59 = vld [vmem:[%s1924_s2 + $0x188] sm:$0xff]  ;;  %v68_v61 = vld [vmem:[%s1924_s2 + $0x100] sm:$0xff]  ;;  %v115_v62 = vld [vmem:[%s1924_s2 + $0x278] sm:$0xff] }
  0x16   :  { %322 = vmatpush.msra.mxu1 %v58_v38  ;;  %303 = vmatpush.msra.mxu0 %v41_v40  ;;  %v147_v63 = vld [vmem:[%s1924_s2 + $0x378] sm:$0xff]  ;;  %v52_v0 = vld [vmem:[%s1924_s2 + $0x80] sm:$0xff]  ;;  %v114_v2 = vld [vmem:[%s1924_s2 + $0x270] sm:$0xff] }
  0x17   :  { %362 = vmatpush.msra.mxu3 %v90_v39  ;;  %343 = vmatpush.msra.mxu2 %v73_v41  ;;  %v84_v1 = vld [vmem:[%s1924_s2 + $0x180] sm:$0xff]  ;;  %v131_v3 = vld [vmem:[%s1924_s2 + $0x2f8] sm:$0xff]  ;;  %v146_v4 = vld [vmem:[%s1924_s2 + $0x370] sm:$0xff] }
  0x18   :  { %323 = vmatpush.msra.mxu1 %v57_v42  ;;  %304 = vmatpush.msra.mxu0 %v40_v44  ;;  %v163_v5 = vld [vmem:[%s1924_s2 + $0x3f8] sm:$0xff]  ;;  %v113_v6 = vld [vmem:[%s1924_s2 + $0x268] sm:$0xff]  ;;  %v130_v7 = vld [vmem:[%s1924_s2 + $0x2f0] sm:$0xff] }
  0x19   :  { %363 = vmatpush.msra.mxu3 %v89_v43  ;;  %344 = vmatpush.msra.mxu2 %v72_v45  ;;  %v145_v8 = vld [vmem:[%s1924_s2 + $0x368] sm:$0xff]  ;;  %v162_v9 = vld [vmem:[%s1924_s2 + $0x3f0] sm:$0xff]  ;;  %v112_v10 = vld [vmem:[%s1924_s2 + $0x260] sm:$0xff] }
  0x1a   :  { %324 = vmatpush.msra.mxu1 %v56_v46  ;;  %305 = vmatpush.msra.mxu0 %v39_v48  ;;  %v129_v11 = vld [vmem:[%s1924_s2 + $0x2e8] sm:$0xff]  ;;  %v144_v12 = vld [vmem:[%s1924_s2 + $0x360] sm:$0xff]  ;;  %v111_v14 = vld [vmem:[%s1924_s2 + $0x258] sm:$0xff] }
  0x1b   :  { %364 = vmatpush.msra.mxu3 %v88_v47  ;;  %345 = vmatpush.msra.mxu2 %v71_v49  ;;  %v161_v13 = vld [vmem:[%s1924_s2 + $0x3e8] sm:$0xff]  ;;  %v128_v15 = vld [vmem:[%s1924_s2 + $0x2e0] sm:$0xff]  ;;  %v143_v16 = vld [vmem:[%s1924_s2 + $0x358] sm:$0xff] }
  0x1c   :  { %325 = vmatpush.msra.mxu1 %v55_v50  ;;  %306 = vmatpush.msra.mxu0 %v38_v52  ;;  %v160_v17 = vld [vmem:[%s1924_s2 + $0x3e0] sm:$0xff]  ;;  %v110_v18 = vld [vmem:[%s1924_s2 + $0x250] sm:$0xff]  ;;  %v127_v19 = vld [vmem:[%s1924_s2 + $0x2d8] sm:$0xff] }
  0x1d   :  { %365 = vmatpush.msra.mxu3 %v87_v51  ;;  %346 = vmatpush.msra.mxu2 %v70_v53  ;;  %v142_v20 = vld [vmem:[%s1924_s2 + $0x350] sm:$0xff]  ;;  %v159_v21 = vld [vmem:[%s1924_s2 + $0x3d8] sm:$0xff]  ;;  %v109_v22 = vld [vmem:[%s1924_s2 + $0x248] sm:$0xff] }
  0x1e   :  { %326 = vmatpush.msra.mxu1 %v54_v54  ;;  %307 = vmatpush.msra.mxu0 %v37_v56  ;;  %v126_v23 = vld [vmem:[%s1924_s2 + $0x2d0] sm:$0xff]  ;;  %v141_v24 = vld [vmem:[%s1924_s2 + $0x348] sm:$0xff]  ;;  %v108_v26 = vld [vmem:[%s1924_s2 + $0x240] sm:$0xff] }
  0x1f   :  { %366 = vmatpush.msra.mxu3 %v86_v55  ;;  %347 = vmatpush.msra.mxu2 %v69_v57  ;;  %v158_v25 = vld [vmem:[%s1924_s2 + $0x3d0] sm:$0xff]  ;;  %v125_v27 = vld [vmem:[%s1924_s2 + $0x2c8] sm:$0xff]  ;;  %v140_v28 = vld [vmem:[%s1924_s2 + $0x340] sm:$0xff] }
  0x20   :  { %327 = vmatpush.msra.mxu1 %v53_v58  ;;  %308 = vmatpush.msra.mxu0 %v36_v60  ;;  %v157_v29 = vld [vmem:[%s1924_s2 + $0x3c8] sm:$0xff]  ;;  %v107_v30 = vld [vmem:[%s1924_s2 + $0x238] sm:$0xff]  ;;  %v124_v31 = vld [vmem:[%s1924_s2 + $0x2c0] sm:$0xff] }
  0x21   :  { %367 = vmatpush.msra.mxu3 %v85_v59  ;;  %348 = vmatpush.msra.mxu2 %v68_v61  ;;  %v139_v32 = vld [vmem:[%s1924_s2 + $0x338] sm:$0xff]  ;;  %v156_v33 = vld [vmem:[%s1924_s2 + $0x3c0] sm:$0xff]  ;;  %v106_v34 = vld [vmem:[%s1924_s2 + $0x230] sm:$0xff] }
  0x22   :  { %373 = vmatpush.msrb.mxu0 %v115_v62  ;;  %328 = vmatpush.msra.mxu1 %v52_v0  ;;  %v123_v35 = vld [vmem:[%s1924_s2 + $0x2b8] sm:$0xff]  ;;  %v138_v36 = vld [vmem:[%s1924_s2 + $0x330] sm:$0xff]  ;;  %v105_v38 = vld [vmem:[%s1924_s2 + $0x228] sm:$0xff] }
  0x23   :  { %413 = vmatpush.msrb.mxu2 %v147_v63  ;;  %368 = vmatpush.msra.mxu3 %v84_v1  ;;  %v155_v37 = vld [vmem:[%s1924_s2 + $0x3b8] sm:$0xff]  ;;  %v122_v39 = vld [vmem:[%s1924_s2 + $0x2b0] sm:$0xff]  ;;  %v137_v40 = vld [vmem:[%s1924_s2 + $0x328] sm:$0xff] }
  0x24   :  { %374 = vmatpush.msrb.mxu0 %v114_v2  ;;  %393 = vmatpush.msrb.mxu1 %v131_v3  ;;  %v154_v41 = vld [vmem:[%s1924_s2 + $0x3b0] sm:$0xff]  ;;  %v104_v42 = vld [vmem:[%s1924_s2 + $0x220] sm:$0xff]  ;;  %v121_v43 = vld [vmem:[%s1924_s2 + $0x2a8] sm:$0xff] }
  0x25   :  { %414 = vmatpush.msrb.mxu2 %v146_v4  ;;  %433 = vmatpush.msrb.mxu3 %v163_v5  ;;  %v136_v44 = vld [vmem:[%s1924_s2 + $0x320] sm:$0xff]  ;;  %v153_v45 = vld [vmem:[%s1924_s2 + $0x3a8] sm:$0xff]  ;;  %v103_v46 = vld [vmem:[%s1924_s2 + $0x218] sm:$0xff] }
  0x26   :  { %375 = vmatpush.msrb.mxu0 %v113_v6  ;;  %394 = vmatpush.msrb.mxu1 %v130_v7  ;;  %v120_v47 = vld [vmem:[%s1924_s2 + $0x2a0] sm:$0xff]  ;;  %v135_v48 = vld [vmem:[%s1924_s2 + $0x318] sm:$0xff]  ;;  %v102_v50 = vld [vmem:[%s1924_s2 + $0x210] sm:$0xff] }
  0x27   :  { %415 = vmatpush.msrb.mxu2 %v145_v8  ;;  %434 = vmatpush.msrb.mxu3 %v162_v9  ;;  %v152_v49 = vld [vmem:[%s1924_s2 + $0x3a0] sm:$0xff]  ;;  %v119_v51 = vld [vmem:[%s1924_s2 + $0x298] sm:$0xff]  ;;  %v134_v52 = vld [vmem:[%s1924_s2 + $0x310] sm:$0xff] }
  0x28   :  { %376 = vmatpush.msrb.mxu0 %v112_v10  ;;  %395 = vmatpush.msrb.mxu1 %v129_v11  ;;  %v151_v53 = vld [vmem:[%s1924_s2 + $0x398] sm:$0xff]  ;;  %v101_v54 = vld [vmem:[%s1924_s2 + $0x208] sm:$0xff]  ;;  %v118_v55 = vld [vmem:[%s1924_s2 + $0x290] sm:$0xff] }
  0x29   :  { %416 = vmatpush.msrb.mxu2 %v144_v12  ;;  %435 = vmatpush.msrb.mxu3 %v161_v13  ;;  %v133_v56 = vld [vmem:[%s1924_s2 + $0x308] sm:$0xff]  ;;  %v150_v57 = vld [vmem:[%s1924_s2 + $0x390] sm:$0xff]  ;;  %v100_v58 = vld [vmem:[%s1924_s2 + $0x200] sm:$0xff] }
  0x2a   :  { %377 = vmatpush.msrb.mxu0 %v111_v14  ;;  %396 = vmatpush.msrb.mxu1 %v128_v15  ;;  %v117_v59 = vld [vmem:[%s1924_s2 + $0x288] sm:$0xff]  ;;  %v132_v60 = vld [vmem:[%s1924_s2 + $0x300] sm:$0xff]  ;;  %v22_v63 = vld [vmem:[%s1922_s0 + $0x10] sm:$0xff] }
  0x2b   :  { %417 = vmatpush.msrb.mxu2 %v143_v16  ;;  %436 = vmatpush.msrb.mxu3 %v160_v17  ;;  %v149_v61 = vld [vmem:[%s1924_s2 + $0x388] sm:$0xff]  ;;  %v20_v62 = vld [vmem:[%s1922_s0] sm:$0xff]  ;;  %v179_v0 = vld [vmem:[%s1924_s2 + $0x478] sm:$0xff] }
  0x2c   :  { %378 = vmatpush.msrb.mxu0 %v110_v18  ;;  %397 = vmatpush.msrb.mxu1 %v127_v19  ;;  %v211_v1 = vld [vmem:[%s1924_s2 + $0x578] sm:$0xff]  ;;  %v116_v2 = vld [vmem:[%s1924_s2 + $0x280] sm:$0xff] }
  0x2d   :  { %418 = vmatpush.msrb.mxu2 %v142_v20  ;;  %437 = vmatpush.msrb.mxu3 %v159_v21  ;;  %v148_v3 = vld [vmem:[%s1924_s2 + $0x380] sm:$0xff] }
  0x2e   :  { %379 = vmatpush.msrb.mxu0 %v109_v22  ;;  %398 = vmatpush.msrb.mxu1 %v126_v23 }
  0x2f   :  { %419 = vmatpush.msrb.mxu2 %v141_v24  ;;  %438 = vmatpush.msrb.mxu3 %v158_v25 }
  0x30   :  { %380 = vmatpush.msrb.mxu0 %v108_v26  ;;  %399 = vmatpush.msrb.mxu1 %v125_v27 }
  0x31   :  { %420 = vmatpush.msrb.mxu2 %v140_v28  ;;  %439 = vmatpush.msrb.mxu3 %v157_v29 }
  0x32   :  { %381 = vmatpush.msrb.mxu0 %v107_v30  ;;  %400 = vmatpush.msrb.mxu1 %v124_v31 }
  0x33   :  { %421 = vmatpush.msrb.mxu2 %v139_v32  ;;  %440 = vmatpush.msrb.mxu3 %v156_v33 }
  0x34   :  { %382 = vmatpush.msrb.mxu0 %v106_v34  ;;  %401 = vmatpush.msrb.mxu1 %v123_v35 }
  0x35   :  { %422 = vmatpush.msrb.mxu2 %v138_v36  ;;  %441 = vmatpush.msrb.mxu3 %v155_v37 }
  0x36   :  { %383 = vmatpush.msrb.mxu0 %v105_v38  ;;  %402 = vmatpush.msrb.mxu1 %v122_v39 }
  0x37   :  { %423 = vmatpush.msrb.mxu2 %v137_v40  ;;  %442 = vmatpush.msrb.mxu3 %v154_v41 }
  0x38   :  { %384 = vmatpush.msrb.mxu0 %v104_v42  ;;  %403 = vmatpush.msrb.mxu1 %v121_v43 }
  0x39   :  { %424 = vmatpush.msrb.mxu2 %v136_v44  ;;  %443 = vmatpush.msrb.mxu3 %v153_v45 }
  0x3a   :  { %385 = vmatpush.msrb.mxu0 %v103_v46  ;;  %404 = vmatpush.msrb.mxu1 %v120_v47 }
  0x3b   :  { %425 = vmatpush.msrb.mxu2 %v135_v48  ;;  %444 = vmatpush.msrb.mxu3 %v152_v49 }
  0x3c   :  { %386 = vmatpush.msrb.mxu0 %v102_v50  ;;  %405 = vmatpush.msrb.mxu1 %v119_v51 }
  0x3d   :  { %426 = vmatpush.msrb.mxu2 %v134_v52  ;;  %445 = vmatpush.msrb.mxu3 %v151_v53 }
  0x3e   :  { %387 = vmatpush.msrb.mxu0 %v101_v54  ;;  %406 = vmatpush.msrb.mxu1 %v118_v55 }
  0x3f   :  { %427 = vmatpush.msrb.mxu2 %v133_v56  ;;  %446 = vmatpush.msrb.mxu3 %v150_v57 }
  0x40   :  { %388 = vmatpush.msrb.mxu0 %v100_v58  ;;  %407 = vmatpush.msrb.mxu1 %v117_v59 }
  0x41   :  { %428 = vmatpush.msrb.mxu2 %v132_v60  ;;  %447 = vmatpush.msrb.mxu3 %v149_v61 }
  0x42   :  { %8 = vsyncpa [#allocation3], 0  ;;  %309 = vmatmul.f32.vlgmr.msra.gmra.mxu0 %v20_v62  ;;  %349 = vmatmul.f32.vlgmr.msra.gmra.mxu2 %v22_v63  ;;  %v21_v4 = vld [vmem:[%s1922_s0 + $0x8] sm:$0xff]  ;;  %v23_v5 = vld [vmem:[%s1922_s0 + $0x18] sm:$0xff]  ;;  %vm670_vm1 = vcmask 1043456   ;;  %vm666_vm2 = vcmask 31744  }
  0x43   :  { %453 = vmatpush.msra.mxu0 %v179_v0  ;;  %493 = vmatpush.msra.mxu2 %v211_v1  ;;  %v178_v6 = vld [vmem:[%s1924_s2 + $0x470] sm:$0xff]  ;;  %v195_v7 = vld [vmem:[%s1924_s2 + $0x4f8] sm:$0xff]  ;;  %v177_v10 = vld [vmem:[%s1924_s2 + $0x468] sm:$0xff]  ;;  %vm782_vm11 = vcmask 64512   ;;  %s965_s29 = sshll.u32 %s1925_s3, 4  ;;  %s966_s29 = int_to_ptr.hbm [resolvable:$true] %s965_s29 }
  0x44   :  { %408 = vmatpush.msrb.mxu1 %v116_v2  ;;  %448 = vmatpush.msrb.mxu3 %v148_v3  ;;  %v210_v8 = vld [vmem:[%s1924_s2 + $0x570] sm:$0xff]  ;;  %v227_v9 = vld [vmem:[%s1924_s2 + $0x5f8] sm:$0xff]  ;;  %v209_v12 = vld [vmem:[%s1924_s2 + $0x568] sm:$0xff] }
  0x45   :  { %329 = vmatmul.f32.vlgmr.msra.gmra.mxu1 %v21_v4  ;;  %369 = vmatmul.f32.vlgmr.msra.gmra.mxu3 %v23_v5  ;;  %v194_v11 = vld [vmem:[%s1924_s2 + $0x4f0] sm:$0xff]  ;;  %v176_v14 = vld [vmem:[%s1924_s2 + $0x460] sm:$0xff]  ;;  %v193_v15 = vld [vmem:[%s1924_s2 + $0x4e8] sm:$0xff] }
  0x46   :  { %454 = vmatpush.msra.mxu0 %v178_v6  ;;  %473 = vmatpush.msra.mxu1 %v195_v7  ;;  %v226_v13 = vld [vmem:[%s1924_s2 + $0x5f0] sm:$0xff]  ;;  %v208_v16 = vld [vmem:[%s1924_s2 + $0x560] sm:$0xff]  ;;  %v225_v17 = vld [vmem:[%s1924_s2 + $0x5e8] sm:$0xff] }
  0x47   :  { %494 = vmatpush.msra.mxu2 %v210_v8  ;;  %513 = vmatpush.msra.mxu3 %v227_v9  ;;  %v26_v18 = vld [vmem:[%s1922_s0 + $0x30] sm:$0xff]  ;;  %v175_v19 = vld [vmem:[%s1924_s2 + $0x458] sm:$0xff]  ;;  %v192_v20 = vld [vmem:[%s1924_s2 + $0x4e0] sm:$0xff] }
  0x48   :  { %455 = vmatpush.msra.mxu0 %v177_v10  ;;  %474 = vmatpush.msra.mxu1 %v194_v11  ;;  %v207_v21 = vld [vmem:[%s1924_s2 + $0x558] sm:$0xff]  ;;  %v224_v22 = vld [vmem:[%s1924_s2 + $0x5e0] sm:$0xff]  ;;  %v174_v25 = vld [vmem:[%s1924_s2 + $0x450] sm:$0xff] }
  0x49   :  { %495 = vmatpush.msra.mxu2 %v209_v12  ;;  %514 = vmatpush.msra.mxu3 %v226_v13  ;;  %v24_v23 = vld [vmem:[%s1922_s0 + $0x20] sm:$0xff]  ;;  %v27_v24 = vld [vmem:[%s1922_s0 + $0x38] sm:$0xff]  ;;  %v206_v27 = vld [vmem:[%s1924_s2 + $0x550] sm:$0xff] }
  0x4a   :  { %456 = vmatpush.msra.mxu0 %v176_v14  ;;  %475 = vmatpush.msra.mxu1 %v193_v15  ;;  %v191_v26 = vld [vmem:[%s1924_s2 + $0x4d8] sm:$0xff]  ;;  %v25_v29 = vld [vmem:[%s1922_s0 + $0x28] sm:$0xff]  ;;  %v190_v31 = vld [vmem:[%s1924_s2 + $0x4d0] sm:$0xff] }
  0x4b   :  { %496 = vmatpush.msra.mxu2 %v208_v16  ;;  %515 = vmatpush.msra.mxu3 %v225_v17  ;;  %v223_v28 = vld [vmem:[%s1924_s2 + $0x5d8] sm:$0xff]  ;;  %v173_v30 = vld [vmem:[%s1924_s2 + $0x448] sm:$0xff]  ;;  %v222_v33 = vld [vmem:[%s1924_s2 + $0x5d0] sm:$0xff] }
  0x4c   :  { %429 = vmatmul.f32.vlgmr.msrb.gmra.mxu2 %v26_v18  ;;  %457 = vmatpush.msra.mxu0 %v175_v19  ;;  %v205_v32 = vld [vmem:[%s1924_s2 + $0x548] sm:$0xff]  ;;  %v172_v34 = vld [vmem:[%s1924_s2 + $0x440] sm:$0xff]  ;;  %v171_v38 = vld [vmem:[%s1924_s2 + $0x438] sm:$0xff] }
  0x4d   :  { %476 = vmatpush.msra.mxu1 %v192_v20  ;;  %497 = vmatpush.msra.mxu2 %v207_v21  ;;  %v189_v35 = vld [vmem:[%s1924_s2 + $0x4c8] sm:$0xff]  ;;  %v204_v36 = vld [vmem:[%s1924_s2 + $0x540] sm:$0xff]  ;;  %v203_v40 = vld [vmem:[%s1924_s2 + $0x538] sm:$0xff] }
  0x4e   :  { %516 = vmatpush.msra.mxu3 %v224_v22  ;;  %389 = vmatmul.f32.vlgmr.msrb.gmra.mxu0 %v24_v23  ;;  %v221_v37 = vld [vmem:[%s1924_s2 + $0x5c8] sm:$0xff]  ;;  %v188_v39 = vld [vmem:[%s1924_s2 + $0x4c0] sm:$0xff]  ;;  %v170_v42 = vld [vmem:[%s1924_s2 + $0x430] sm:$0xff] }
  0x4f   :  { %449 = vmatmul.f32.vlgmr.msrb.gmra.mxu3 %v27_v24  ;;  %458 = vmatpush.msra.mxu0 %v174_v25  ;;  %v220_v41 = vld [vmem:[%s1924_s2 + $0x5c0] sm:$0xff]  ;;  %v187_v43 = vld [vmem:[%s1924_s2 + $0x4b8] sm:$0xff]  ;;  %v202_v44 = vld [vmem:[%s1924_s2 + $0x530] sm:$0xff] }
  0x50   :  { %477 = vmatpush.msra.mxu1 %v191_v26  ;;  %498 = vmatpush.msra.mxu2 %v206_v27  ;;  %v219_v45 = vld [vmem:[%s1924_s2 + $0x5b8] sm:$0xff]  ;;  %v169_v46 = vld [vmem:[%s1924_s2 + $0x428] sm:$0xff]  ;;  %v186_v47 = vld [vmem:[%s1924_s2 + $0x4b0] sm:$0xff] }
  0x51   :  { %517 = vmatpush.msra.mxu3 %v223_v28  ;;  %409 = vmatmul.f32.vlgmr.msrb.gmra.mxu1 %v25_v29  ;;  %v201_v48 = vld [vmem:[%s1924_s2 + $0x528] sm:$0xff]  ;;  %v218_v49 = vld [vmem:[%s1924_s2 + $0x5b0] sm:$0xff]  ;;  %v168_v50 = vld [vmem:[%s1924_s2 + $0x420] sm:$0xff] }
  0x52   :  { %459 = vmatpush.msra.mxu0 %v173_v30  ;;  %478 = vmatpush.msra.mxu1 %v190_v31  ;;  %v185_v51 = vld [vmem:[%s1924_s2 + $0x4a8] sm:$0xff]  ;;  %v200_v52 = vld [vmem:[%s1924_s2 + $0x520] sm:$0xff]  ;;  %v167_v54 = vld [vmem:[%s1924_s2 + $0x418] sm:$0xff] }
  0x53   :  { %499 = vmatpush.msra.mxu2 %v205_v32  ;;  %518 = vmatpush.msra.mxu3 %v222_v33  ;;  %v217_v53 = vld [vmem:[%s1924_s2 + $0x5a8] sm:$0xff]  ;;  %v184_v55 = vld [vmem:[%s1924_s2 + $0x4a0] sm:$0xff]  ;;  %v199_v56 = vld [vmem:[%s1924_s2 + $0x518] sm:$0xff] }
  0x54   :  { %460 = vmatpush.msra.mxu0 %v172_v34  ;;  %479 = vmatpush.msra.mxu1 %v189_v35  ;;  %v216_v57 = vld [vmem:[%s1924_s2 + $0x5a0] sm:$0xff]  ;;  %v166_v58 = vld [vmem:[%s1924_s2 + $0x410] sm:$0xff]  ;;  %v183_v59 = vld [vmem:[%s1924_s2 + $0x498] sm:$0xff] }
  0x55   :  { %500 = vmatpush.msra.mxu2 %v204_v36  ;;  %519 = vmatpush.msra.mxu3 %v221_v37  ;;  %v198_v60 = vld [vmem:[%s1924_s2 + $0x510] sm:$0xff]  ;;  %v215_v61 = vld [vmem:[%s1924_s2 + $0x598] sm:$0xff]  ;;  %v165_v62 = vld [vmem:[%s1924_s2 + $0x408] sm:$0xff] }
  0x56   :  { %461 = vmatpush.msra.mxu0 %v171_v38  ;;  %480 = vmatpush.msra.mxu1 %v188_v39  ;;  %v182_v63 = vld [vmem:[%s1924_s2 + $0x490] sm:$0xff]  ;;  %v197_v0 = vld [vmem:[%s1924_s2 + $0x508] sm:$0xff]  ;;  %v164_v2 = vld [vmem:[%s1924_s2 + $0x400] sm:$0xff] }
  0x57   :  { %501 = vmatpush.msra.mxu2 %v203_v40  ;;  %520 = vmatpush.msra.mxu3 %v220_v41  ;;  %v214_v1 = vld [vmem:[%s1924_s2 + $0x590] sm:$0xff]  ;;  %v181_v3 = vld [vmem:[%s1924_s2 + $0x488] sm:$0xff]  ;;  %v196_v4 = vld [vmem:[%s1924_s2 + $0x500] sm:$0xff] }
  0x58   :  { %462 = vmatpush.msra.mxu0 %v170_v42  ;;  %481 = vmatpush.msra.mxu1 %v187_v43  ;;  %v213_v5 = vld [vmem:[%s1924_s2 + $0x588] sm:$0xff]  ;;  %v28_v6 = vld [vmem:[%s1922_s0 + $0x40] sm:$0xff]  ;;  %v30_v7 = vld [vmem:[%s1922_s0 + $0x50] sm:$0xff] }
  0x59   :  { %502 = vmatpush.msra.mxu2 %v202_v44  ;;  %521 = vmatpush.msra.mxu3 %v219_v45  ;;  %v243_v8 = vld [vmem:[%s1924_s2 + $0x678] sm:$0xff]  ;;  %v180_v10 = vld [vmem:[%s1924_s2 + $0x480] sm:$0xff]  ;;  %v29_v12 = vld [vmem:[%s1922_s0 + $0x48] sm:$0xff] }
  0x5a   :  { %463 = vmatpush.msra.mxu0 %v169_v46  ;;  %482 = vmatpush.msra.mxu1 %v186_v47  ;;  %v275_v9 = vld [vmem:[%s1924_s2 + $0x778] sm:$0xff]  ;;  %v212_v11 = vld [vmem:[%s1924_s2 + $0x580] sm:$0xff]  ;;  %v242_v14 = vld [vmem:[%s1924_s2 + $0x670] sm:$0xff] }
  0x5b   :  { %503 = vmatpush.msra.mxu2 %v201_v48  ;;  %522 = vmatpush.msra.mxu3 %v218_v49  ;;  %v31_v13 = vld [vmem:[%s1922_s0 + $0x58] sm:$0xff]  ;;  %v274_v16 = vld [vmem:[%s1924_s2 + $0x770] sm:$0xff]  ;;  %v241_v18 = vld [vmem:[%s1924_s2 + $0x668] sm:$0xff] }
  0x5c   :  { %464 = vmatpush.msra.mxu0 %v168_v50  ;;  %483 = vmatpush.msra.mxu1 %v185_v51  ;;  %v259_v15 = vld [vmem:[%s1924_s2 + $0x6f8] sm:$0xff]  ;;  %v258_v19 = vld [vmem:[%s1924_s2 + $0x6f0] sm:$0xff]  ;;  %v273_v20 = vld [vmem:[%s1924_s2 + $0x768] sm:$0xff] }
  0x5d   :  { %504 = vmatpush.msra.mxu2 %v200_v52  ;;  %523 = vmatpush.msra.mxu3 %v217_v53  ;;  %v291_v17 = vld [vmem:[%s1924_s2 + $0x7f8] sm:$0xff]  ;;  %v290_v21 = vld [vmem:[%s1924_s2 + $0x7f0] sm:$0xff]  ;;  %v240_v22 = vld [vmem:[%s1924_s2 + $0x660] sm:$0xff] }
  0x5e   :  { %465 = vmatpush.msra.mxu0 %v167_v54  ;;  %484 = vmatpush.msra.mxu1 %v184_v55  ;;  %v257_v23 = vld [vmem:[%s1924_s2 + $0x6e8] sm:$0xff]  ;;  %v272_v24 = vld [vmem:[%s1924_s2 + $0x760] sm:$0xff]  ;;  %v239_v26 = vld [vmem:[%s1924_s2 + $0x658] sm:$0xff] }
  0x5f   :  { %505 = vmatpush.msra.mxu2 %v199_v56  ;;  %524 = vmatpush.msra.mxu3 %v216_v57  ;;  %v289_v25 = vld [vmem:[%s1924_s2 + $0x7e8] sm:$0xff]  ;;  %v256_v27 = vld [vmem:[%s1924_s2 + $0x6e0] sm:$0xff]  ;;  %v271_v28 = vld [vmem:[%s1924_s2 + $0x758] sm:$0xff] }
  0x60   :  { %466 = vmatpush.msra.mxu0 %v166_v58  ;;  %485 = vmatpush.msra.mxu1 %v183_v59  ;;  %v288_v29 = vld [vmem:[%s1924_s2 + $0x7e0] sm:$0xff]  ;;  %v238_v30 = vld [vmem:[%s1924_s2 + $0x650] sm:$0xff]  ;;  %v255_v31 = vld [vmem:[%s1924_s2 + $0x6d8] sm:$0xff] }
  0x61   :  { %506 = vmatpush.msra.mxu2 %v198_v60  ;;  %525 = vmatpush.msra.mxu3 %v215_v61  ;;  %v270_v32 = vld [vmem:[%s1924_s2 + $0x750] sm:$0xff]  ;;  %v287_v33 = vld [vmem:[%s1924_s2 + $0x7d8] sm:$0xff]  ;;  %v237_v34 = vld [vmem:[%s1924_s2 + $0x648] sm:$0xff] }
  0x62   :  { %467 = vmatpush.msra.mxu0 %v165_v62  ;;  %486 = vmatpush.msra.mxu1 %v182_v63  ;;  %v254_v35 = vld [vmem:[%s1924_s2 + $0x6d0] sm:$0xff]  ;;  %v269_v36 = vld [vmem:[%s1924_s2 + $0x748] sm:$0xff]  ;;  %v236_v38 = vld [vmem:[%s1924_s2 + $0x640] sm:$0xff] }
  0x63   :  { %507 = vmatpush.msra.mxu2 %v197_v0  ;;  %526 = vmatpush.msra.mxu3 %v214_v1  ;;  %v286_v37 = vld [vmem:[%s1924_s2 + $0x7d0] sm:$0xff]  ;;  %v253_v39 = vld [vmem:[%s1924_s2 + $0x6c8] sm:$0xff]  ;;  %v268_v40 = vld [vmem:[%s1924_s2 + $0x740] sm:$0xff] }
  0x64   :  { %468 = vmatpush.msra.mxu0 %v164_v2  ;;  %487 = vmatpush.msra.mxu1 %v181_v3  ;;  %v285_v41 = vld [vmem:[%s1924_s2 + $0x7c8] sm:$0xff]  ;;  %v235_v42 = vld [vmem:[%s1924_s2 + $0x638] sm:$0xff]  ;;  %v252_v43 = vld [vmem:[%s1924_s2 + $0x6c0] sm:$0xff] }
  0x65   :  { %508 = vmatpush.msra.mxu2 %v196_v4  ;;  %527 = vmatpush.msra.mxu3 %v213_v5  ;;  %v267_v44 = vld [vmem:[%s1924_s2 + $0x738] sm:$0xff]  ;;  %v284_v45 = vld [vmem:[%s1924_s2 + $0x7c0] sm:$0xff]  ;;  %v234_v46 = vld [vmem:[%s1924_s2 + $0x630] sm:$0xff] }
  0x66   :  { %469 = vmatmul.f32.vlgmr.msra.gmra.mxu0 %v28_v6  ;;  %509 = vmatmul.f32.vlgmr.msra.gmra.mxu2 %v30_v7  ;;  %v251_v47 = vld [vmem:[%s1924_s2 + $0x6b8] sm:$0xff]  ;;  %v266_v48 = vld [vmem:[%s1924_s2 + $0x730] sm:$0xff]  ;;  %v233_v50 = vld [vmem:[%s1924_s2 + $0x628] sm:$0xff] }
  0x67   :  { %533 = vmatpush.msrb.mxu0 %v243_v8  ;;  %573 = vmatpush.msrb.mxu2 %v275_v9  ;;  %v283_v49 = vld [vmem:[%s1924_s2 + $0x7b8] sm:$0xff]  ;;  %v250_v51 = vld [vmem:[%s1924_s2 + $0x6b0] sm:$0xff]  ;;  %v265_v52 = vld [vmem:[%s1924_s2 + $0x728] sm:$0xff] }
  0x68   :  { %488 = vmatpush.msra.mxu1 %v180_v10  ;;  %528 = vmatpush.msra.mxu3 %v212_v11  ;;  %v282_v53 = vld [vmem:[%s1924_s2 + $0x7b0] sm:$0xff]  ;;  %v232_v54 = vld [vmem:[%s1924_s2 + $0x620] sm:$0xff]  ;;  %v249_v55 = vld [vmem:[%s1924_s2 + $0x6a8] sm:$0xff] }
  0x69   :  { %489 = vmatmul.f32.vlgmr.msra.gmra.mxu1 %v29_v12  ;;  %529 = vmatmul.f32.vlgmr.msra.gmra.mxu3 %v31_v13  ;;  %v264_v56 = vld [vmem:[%s1924_s2 + $0x720] sm:$0xff]  ;;  %v281_v57 = vld [vmem:[%s1924_s2 + $0x7a8] sm:$0xff]  ;;  %v231_v58 = vld [vmem:[%s1924_s2 + $0x618] sm:$0xff] }
  0x6a   :  { %534 = vmatpush.msrb.mxu0 %v242_v14  ;;  %553 = vmatpush.msrb.mxu1 %v259_v15  ;;  %v248_v59 = vld [vmem:[%s1924_s2 + $0x6a0] sm:$0xff]  ;;  %v263_v60 = vld [vmem:[%s1924_s2 + $0x718] sm:$0xff]  ;;  %v230_v62 = vld [vmem:[%s1924_s2 + $0x610] sm:$0xff] }
  0x6b   :  { %574 = vmatpush.msrb.mxu2 %v274_v16  ;;  %593 = vmatpush.msrb.mxu3 %v291_v17  ;;  %v280_v61 = vld [vmem:[%s1924_s2 + $0x7a0] sm:$0xff]  ;;  %v247_v63 = vld [vmem:[%s1924_s2 + $0x698] sm:$0xff]  ;;  %v262_v0 = vld [vmem:[%s1924_s2 + $0x710] sm:$0xff] }
  0x6c   :  { %535 = vmatpush.msrb.mxu0 %v241_v18  ;;  %554 = vmatpush.msrb.mxu1 %v258_v19  ;;  %v279_v1 = vld [vmem:[%s1924_s2 + $0x798] sm:$0xff]  ;;  %v229_v2 = vld [vmem:[%s1924_s2 + $0x608] sm:$0xff]  ;;  %v246_v3 = vld [vmem:[%s1924_s2 + $0x690] sm:$0xff] }
  0x6d   :  { %575 = vmatpush.msrb.mxu2 %v273_v20  ;;  %594 = vmatpush.msrb.mxu3 %v290_v21  ;;  %v261_v4 = vld [vmem:[%s1924_s2 + $0x708] sm:$0xff]  ;;  %v278_v5 = vld [vmem:[%s1924_s2 + $0x790] sm:$0xff]  ;;  %v228_v6 = vld [vmem:[%s1924_s2 + $0x600] sm:$0xff] }
  0x6e   :  { %536 = vmatpush.msrb.mxu0 %v240_v22  ;;  %555 = vmatpush.msrb.mxu1 %v257_v23  ;;  %v245_v7 = vld [vmem:[%s1924_s2 + $0x688] sm:$0xff]  ;;  %v260_v8 = vld [vmem:[%s1924_s2 + $0x700] sm:$0xff]  ;;  %v34_v11 = vld [vmem:[%s1922_s0 + $0x70] sm:$0xff] }
  0x6f   :  { %576 = vmatpush.msrb.mxu2 %v272_v24  ;;  %595 = vmatpush.msrb.mxu3 %v289_v25  ;;  %v277_v9 = vld [vmem:[%s1924_s2 + $0x788] sm:$0xff]  ;;  %v32_v10 = vld [vmem:[%s1922_s0 + $0x60] sm:$0xff]  ;;  %v35_v15 = vld [vmem:[%s1922_s0 + $0x78] sm:$0xff] }
  0x70   :  { %537 = vmatpush.msrb.mxu0 %v239_v26  ;;  %556 = vmatpush.msrb.mxu1 %v256_v27  ;;  %v244_v12 = vld [vmem:[%s1924_s2 + $0x680] sm:$0xff]  ;;  %v33_v14 = vld [vmem:[%s1922_s0 + $0x68] sm:$0xff] }
  0x71   :  { %577 = vmatpush.msrb.mxu2 %v271_v28  ;;  %596 = vmatpush.msrb.mxu3 %v288_v29  ;;  %v276_v13 = vld [vmem:[%s1924_s2 + $0x780] sm:$0xff] }
  0x72   :  { %538 = vmatpush.msrb.mxu0 %v238_v30  ;;  %557 = vmatpush.msrb.mxu1 %v255_v31  ;;  %v1878_v16 = vld [vmem:[%s1924_s2 + $0x820] sm:$0xff] }
  0x73   :  { %578 = vmatpush.msrb.mxu2 %v270_v32  ;;  %597 = vmatpush.msrb.mxu3 %v287_v33  ;;  %v292_v17 = vperm.slane %v1878_v16, 3  ;;  %v1035_v32 = vmov 1.4142135  }
  0x74   :  { %539 = vmatpush.msrb.mxu0 %v237_v34  ;;  %558 = vmatpush.msrb.mxu1 %v254_v35  ;;  %995 = vrcp.f32 %v1035_v32 }
  0x75   :  { %579 = vmatpush.msrb.mxu2 %v269_v36  ;;  %598 = vmatpush.msrb.mxu3 %v286_v37 }
  0x76   :  { %540 = vmatpush.msrb.mxu0 %v236_v38  ;;  %559 = vmatpush.msrb.mxu1 %v253_v39 }
  0x77   :  { %580 = vmatpush.msrb.mxu2 %v268_v40  ;;  %599 = vmatpush.msrb.mxu3 %v285_v41 }
  0x78   :  { %541 = vmatpush.msrb.mxu0 %v235_v42  ;;  %560 = vmatpush.msrb.mxu1 %v252_v43 }
  0x79   :  { %581 = vmatpush.msrb.mxu2 %v267_v44  ;;  %600 = vmatpush.msrb.mxu3 %v284_v45 }
  0x7a   :  { %542 = vmatpush.msrb.mxu0 %v234_v46  ;;  %561 = vmatpush.msrb.mxu1 %v251_v47  ;;  %v996_v36 = vpop.eup %995 }
  0x7b   :  { %582 = vmatpush.msrb.mxu2 %v266_v48  ;;  %601 = vmatpush.msrb.mxu3 %v283_v49  ;;  %v615_v40 = vmul.f32 1.4142135, %v996_v36  ;;  %vm619_vm0 = vweird.f32 %v996_v36 }
  0x7c   :  { %543 = vmatpush.msrb.mxu0 %v233_v50  ;;  %562 = vmatpush.msrb.mxu1 %v250_v51 }
  0x7d   :  { %583 = vmatpush.msrb.mxu2 %v265_v52  ;;  %602 = vmatpush.msrb.mxu3 %v282_v53  ;;  %v616_v44 = vsub.f32 1.0, %v615_v40  ;;  %v694_v40 = vperm.slane %v1878_v16, 1 }
  0x7e   :  { %544 = vmatpush.msrb.mxu0 %v232_v54  ;;  %563 = vmatpush.msrb.mxu1 %v249_v55 }
  0x7f   :  { %584 = vmatpush.msrb.mxu2 %v264_v56  ;;  %603 = vmatpush.msrb.mxu3 %v281_v57  ;;  %v617_v47 = vmul.f32 %v996_v36, %v616_v44 }
  0x80   :  { %545 = vmatpush.msrb.mxu0 %v231_v58  ;;  %564 = vmatpush.msrb.mxu1 %v248_v59 }
  0x81   :  { %585 = vmatpush.msrb.mxu2 %v263_v60  ;;  %604 = vmatpush.msrb.mxu3 %v280_v61  ;;  %v618_v50 = vadd.f32 %v996_v36, %v617_v47 }
  0x82   :  { %546 = vmatpush.msrb.mxu0 %v230_v62  ;;  %565 = vmatpush.msrb.mxu1 %v247_v63 }
  0x83   :  { %586 = vmatpush.msrb.mxu2 %v262_v0  ;;  %605 = vmatpush.msrb.mxu3 %v279_v1  ;;  %v620_v55 = vsel %vm619_vm0, %v996_v36, %v618_v50  ;;  %v721_v50 = vperm.slane %v1878_v16, 2 }
  0x84   :  { %547 = vmatpush.msrb.mxu0 %v229_v2  ;;  %566 = vmatpush.msrb.mxu1 %v246_v3 }
  0x85   :  { %587 = vmatpush.msrb.mxu2 %v261_v4  ;;  %606 = vmatpush.msrb.mxu3 %v278_v5 }
  0x86   :  { %548 = vmatpush.msrb.mxu0 %v228_v6  ;;  %567 = vmatpush.msrb.mxu1 %v245_v7  ;;  %v16_v7 = vld [vmem:[%s1924_s2 + $0x808] sm:$0xff] }
  0x87   :  { %588 = vmatpush.msrb.mxu2 %v260_v8  ;;  %607 = vmatpush.msrb.mxu3 %v277_v9  ;;  %v17_v8 = vld [vmem:[%s1924_s2 + $0x810] sm:$0xff]  ;;  %v15_v9 = vld [vmem:[%s1924_s2 + $0x800] sm:$0xff] }
  0x88   :  { %549 = vmatmul.f32.vlgmr.msrb.gmra.mxu0 %v32_v10  ;;  %589 = vmatmul.f32.vlgmr.msrb.gmra.mxu2 %v34_v11  ;;  %v664_v11 = vld [vmem:[%s1923_s1] sm:$0xff] }
  0x89   :  { %568 = vmatpush.msrb.mxu1 %v244_v12  ;;  %608 = vmatpush.msrb.mxu3 %v276_v13 }
  0x8a   :  { %569 = vmatmul.f32.vlgmr.msrb.gmra.mxu1 %v33_v14  ;;  %609 = vmatmul.f32.vlgmr.msrb.gmra.mxu3 %v35_v15 }
  0x8b   :  { %977 = vmatpush.msk.msra.mxu1 %vm670_vm1, %v16_v7  ;;  %979 = vmatpush.msk.msra.mxu2 %vm670_vm1, %v17_v8 }
  0x8c   :  { %975 = vmatpush.msk.msra.mxu0 %vm670_vm1, %v15_v9 }
  0x90   :  { %976 = vmatmul.msk.f32.vlgmr.msra.gmra.mxu0 %vm666_vm2, %v664_v11 }
  0xbf   :  { %v310_v18 = vpop.f32.mrf.mxu0 }
  0xc0   :  { %v311_v19 = vadd.f32 %v310_v18, %v292_v17 }
  0xc2   :  { %v330_v20 = vpop.f32.mrf.mxu1 }
  0xc3   :  { %v331_v21 = vadd.f32 %v330_v20, %v311_v19 }
  0xc5   :  { %v350_v22 = vpop.f32.mrf.mxu2 }
  0xc6   :  { %v351_v23 = vadd.f32 %v350_v22, %v331_v21 }
  0xc8   :  { %v370_v24 = vpop.f32.mrf.mxu3 }
  0xc9   :  { %v371_v25 = vadd.f32 %v370_v24, %v351_v23 }
  0xcb   :  { %v390_v26 = vpop.f32.mrf.mxu0 }
  0xcc   :  { %v391_v27 = vadd.f32 %v390_v26, %v371_v25 }
  0xce   :  { %v410_v28 = vpop.f32.mrf.mxu1 }
  0xcf   :  { %v411_v29 = vadd.f32 %v410_v28, %v391_v27  ;;  %v430_v30 = vpop.f32.mrf.mxu2 }
  0xd1   :  { %v431_v31 = vadd.f32 %v430_v30, %v411_v29 }
  0xd2   :  { %v450_v33 = vpop.f32.mrf.mxu3 }
  0xd3   :  { %v451_v35 = vadd.f32 %v450_v33, %v431_v31 }
  0xe3   :  { %v470_v34 = vpop.f32.mrf.mxu0 }
  0xe4   :  { %v471_v37 = vadd.f32 %v470_v34, %v451_v35 }
  0xe6   :  { %v490_v38 = vpop.f32.mrf.mxu1 }
  0xe7   :  { %v491_v41 = vadd.f32 %v490_v38, %v471_v37  ;;  %v745_v37 = vlaneseq }
  0xe9   :  { %v510_v39 = vpop.f32.mrf.mxu2  ;;  %v746_v38 = vand.u32 127, %v745_v37 }
  0xea   :  { %v511_v42 = vadd.f32 %v510_v39, %v491_v41  ;;  %v665_v39 = vperm.slane %v1878_v16, 0 }
  0xeb   :  { %vm807_vm7 = vcmp.ge.s32.totalorder %v746_v38, 2  ;;  %vm808_vm8 = vcmp.lt.s32.totalorder %v746_v38, 4  ;;  %vm748_vm9 = vcmp.lt.s32.totalorder %v746_v38, 2 }
  0xec   :  { %v530_v43 = vpop.f32.mrf.mxu3  ;;  %vm809_vm10 = vmand %vm807_vm7, %vm808_vm8 }
  0xed   :  { %v531_v45 = vadd.f32 %v530_v43, %v511_v42  ;;  %v1036_v43 = vmov 0.0  }
  0xee   :  { %v981_v44 = vsel %vm748_vm9, 1.0, %v1036_v43 }
 0x105   :  { %v550_v46 = vpop.f32.mrf.mxu0 }
 0x106   :  { %v551_v48 = vadd.f32 %v550_v46, %v531_v45  ;;  %v984_v45 = vsel %vm809_vm10, 1.0, %v1036_v43 }
 0x107   :  { %v570_v49 = vpop.f32.mrf.mxu1 }
 0x108   :  { %v571_v51 = vadd.f32 %v570_v49, %v551_v48 }
 0x10b   :  { %v590_v52 = vpop.f32.mrf.mxu2 }
 0x10c   :  { %v591_v53 = vadd.f32 %v590_v52, %v571_v51 }
 0x10d   :  { %v610_v54 = vpop.f32.mrf.mxu3  ;;  %v691_v41 = vpop.f32.mrf.mxu0 }
 0x10e   :  { %v611_v56 = vadd.f32 %v610_v54, %v591_v53  ;;  %v692_v46 = vadd.f32 %v691_v41, %v665_v39 }
 0x110   :  { %v621_v57 = vmul.f32 %v620_v55, %v611_v56  ;;  %v613_v34 = vmul.f32 0.5, %v611_v56  ;;  %v752_v51 = vmul.f32 %v981_v44, %v692_v46  ;;  %v812_v52 = vmul.f32 %v984_v45, %v692_v46 }
 0x112   :  { %v622_v58 = vmul.f32 %v621_v57, %v621_v57 }
 0x114   :  { %v623_v59 = vmin.f32 %v622_v58, 16.0 }
 0x116   :  { %v624_v60 = vmul.f32 2.1237322e-06, %v623_v59  ;;  %v635_v61 = vmul.f32 3.8918573e-05, %v623_v59 }
 0x118   :  { %v625_v62 = vadd.f32 0.00028619796, %v624_v60  ;;  %v636_v63 = vadd.f32 0.001143296, %v635_v61 }
 0x11a   :  { %v626_v0 = vmul.f32 %v625_v62, %v623_v59  ;;  %v637_v1 = vmul.f32 %v636_v63, %v623_v59 }
 0x11c   :  { %v638_v2 = vadd.f32 0.014752088, %v637_v1  ;;  %v627_v3 = vadd.f32 0.0036580483, %v626_v0 }
 0x11e   :  { %v639_v4 = vmul.f32 %v638_v2, %v623_v59  ;;  %v628_v6 = vmul.f32 %v627_v3, %v623_v59 }
 0x120   :  { %v640_v5 = vadd.f32 0.112945676, %v639_v4  ;;  %v629_v13 = vadd.f32 0.05243302, %v628_v6 }
 0x122   :  { %v641_v10 = vmul.f32 %v640_v5, %v623_v59  ;;  %v630_v17 = vmul.f32 %v629_v13, %v623_v59 }
 0x124   :  { %v642_v12 = vadd.f32 0.4994258, %v641_v10  ;;  %v631_v18 = vadd.f32 0.18741608, %v630_v17 }
 0x126   :  { %v643_v14 = vmul.f32 %v642_v12, %v623_v59  ;;  %v632_v20 = vmul.f32 %v631_v18, %v623_v59 }
 0x128   :  { %v644_v15 = vadd.f32 1.0, %v643_v14  ;;  %v633_v24 = vadd.f32 1.1283791, %v632_v20 }
 0x12a   :  { %997 = vrcp.f32 %v644_v15  ;;  %v656_v23 = vand.u32 2147483648, %v644_v15  ;;  %v654_v26 = vand.u32 2147483647, %v644_v15  ;;  %vm650_vm4 = vweird.f32 %v644_v15 }
 0x12b   :  { %v634_v29 = vmul.f32 %v633_v24, %v621_v57 }
 0x12c   :  { %v657_v28 = vor.u32 1.1754944e-38, %v656_v23  ;;  %vm655_vm6 = vcmp.eq.f32.partialorder %v654_v26, 8.507059e+37 }
 0x130   :  { %v998_v19 = vpop.eup %997 }
 0x131   :  { %v646_v21 = vmul.f32 %v998_v19, %v644_v15  ;;  %vm651_vm3 = vweird.f32 %v998_v19 }
 0x132   :  { %vm652_vm5 = vmor %vm650_vm4, %vm651_vm3 }
 0x133   :  { %v647_v22 = vsub.f32 1.0, %v646_v21 }
 0x135   :  { %v648_v25 = vmul.f32 %v998_v19, %v647_v22 }
 0x137   :  { %v649_v27 = vadd.f32 %v998_v19, %v648_v25 }
 0x139   :  { %v653_v30 = vsel %vm652_vm5, %v998_v19, %v649_v27 }
 0x13a   :  { %v658_v31 = vsel %vm655_vm6, %v657_v28, %v653_v30 }
 0x13b   :  { %v659_v32 = vmul.f32 %v658_v31, %v634_v29 }
 0x13d   :  { %v974_v33 = vclamps-f32 %v659_v32, 1.0 }
 0x13f   :  { %v662_v35 = vadd.f32 1.0, %v974_v33 }
 0x141   :  { %v663_v36 = vmul.f32 %v662_v35, %v613_v34  ;;  %v18_v34 = vld [vmem:[%s1924_s2 + $0x818] sm:$0xff]  ;;  %v1037_v35 = vmov 8.0   ;;  %s1038_s2 = smov [#allocation2]  }
 0x142   :  { %s963_s26 = sshll.u32 %s1038_s2, 4  ;;  %s964_s26 = int_to_ptr.vmem [resolvable:$true] %s963_s26 }
 0x143   :  { %978 = vmatmul.msk.f32.vlgmr.msra.gmra.mxu1 %vm666_vm2, %v663_v36  ;;  %980 = vmatmul.msk.f32.vlgmr.msra.gmra.mxu2 %vm666_vm2, %v663_v36 }
 0x1c0   :  { %v718_v42 = vpop.f32.mrf.mxu1 }
 0x1c1   :  { %v719_v47 = vadd.f32 %v718_v42, %v694_v40 }
 0x1c3   :  { %v753_v48 = vmul.f32 %v981_v44, %v719_v47  ;;  %v813_v49 = vmul.f32 %v984_v45, %v719_v47 }
 0x1c5   :  { %982 = vmatpush.xpose.msk.msra.mxu3 %vm666_vm2, %v753_v48  ;;  %985 = vmatpush.xpose.msk.msrb.mxu0 %vm666_vm2, %v813_v49 }
 0x1c6   :  { %v742_v53 = vpop.f32.mrf.mxu2 }
 0x1c7   :  { %v743_v54 = vadd.f32 %v742_v53, %v721_v50  ;;  %v928_v53 = vrot.slane %v1878_v16, 4 }
 0x1c8   :  { %983 = vmatmul.msk.f32.vlgmr.msra.gmra.mxu3 %vm666_vm2, %v752_v51  ;;  %986 = vmatmul.msk.f32.vlgmr.msrb.gmra.mxu0 %vm666_vm2, %v812_v52 }
 0x1c9   :  { %v754_v55 = vmul.f32 %v981_v44, %v743_v54  ;;  %v814_v56 = vmul.f32 %v984_v45, %v743_v54  ;;  %989 = vmatpush.msk.msrb.mxu3 %vm670_vm1, %v18_v34  ;;  %vm956_vm1 = vcmask 8192  }
 0x1cb   :  { %884 = vmatpush.msrb.mxu1 %v814_v56  ;;  %907 = vmatpush.msrb.mxu2 %v754_v55 }
 0x245   :  { %v838_v60 = vpop.f32.mrf.mxu0 }
 0x246   :  { %v841_v61 = vmul.f32 0.70710677, %v838_v60 }
 0x248   :  { %v842_v62 = vsel %vm782_vm11, %v841_v61, -inf }
 0x24b   :  { %v778_v57 = vpop.f32.mrf.mxu3 }
 0x24c   :  { %v781_v58 = vmul.f32 0.70710677, %v778_v57 }
 0x24e   :  { %v783_v59 = vsel %vm782_vm11, %v781_v58, -inf }
 0x24f   :  { %784 = vmax.xlane.f32.xlu0 %v783_v59 }
 0x257   :  { %843 = vmax.xlane.f32.xlu0 %v842_v62 }
 0x2c2   :  { %v785_v63 = vpop.xlane.xlu0 %784 }
 0x2c3   :  { %v786_v0 = vsub.f32 %v781_v58, %v785_v63 }
 0x2c5   :  { %v787_v1 = vmul.f32 1.442695, %v786_v0 }
 0x2c7   :  { %999 = vpow2.f32 %v787_v1 }
 0x2ca   :  { %v844_v2 = vpop.xlane.xlu0 %843 }
 0x2cb   :  { %v845_v3 = vsub.f32 %v841_v61, %v844_v2 }
 0x2cd   :  { %v1000_v4 = vpop.eup %999  ;;  %v846_v5 = vmul.f32 1.442695, %v845_v3 }
 0x2ce   :  { %v789_v6 = vsel %vm782_vm11, %v1000_v4, 0.0 }
 0x2cf   :  { %1001 = vpow2.f32 %v846_v5  ;;  %790 = vadd.xlane.f32.xlu1 %v789_v6 }
 0x2d5   :  { %v1002_v7 = vpop.eup %1001 }
 0x2d6   :  { %v848_v8 = vsel %vm782_vm11, %v1002_v7, 0.0 }
 0x2d7   :  { %849 = vadd.xlane.f32.xlu1 %v848_v8 }
 0x342   :  { %v791_v9 = vpop.xlane.xlu1 %790 }
 0x343   :  { %1003 = vrcp.f32 %v791_v9  ;;  %v803_v14 = vand.u32 2147483648, %v791_v9  ;;  %v801_v17 = vand.u32 2147483647, %v791_v9  ;;  %vm797_vm13 = vweird.f32 %v791_v9 }
 0x345   :  { %v804_v20 = vor.u32 1.1754944e-38, %v803_v14  ;;  %vm802_vm15 = vcmp.eq.f32.partialorder %v801_v17, 8.507059e+37 }
 0x349   :  { %v1004_v10 = vpop.eup %1003 }
 0x34a   :  { %v793_v11 = vmul.f32 %v1004_v10, %v791_v9  ;;  %v850_v12 = vpop.xlane.xlu1 %849  ;;  %vm798_vm12 = vweird.f32 %v1004_v10 }
 0x34b   :  { %1005 = vrcp.f32 %v850_v12  ;;  %vm799_vm14 = vmor %vm797_vm13, %vm798_vm12  ;;  %v862_v26 = vand.u32 2147483648, %v850_v12  ;;  %v860_v28 = vand.u32 2147483647, %v850_v12  ;;  %vm856_vm3 = vweird.f32 %v850_v12 }
 0x34c   :  { %v794_v13 = vsub.f32 1.0, %v793_v11  ;;  %1007 = vrcp.f32 %v1037_v35 }
 0x34d   :  { %v863_v30 = vor.u32 1.1754944e-38, %v862_v26  ;;  %vm861_vm5 = vcmp.eq.f32.partialorder %v860_v28, 8.507059e+37 }
 0x34e   :  { %v795_v15 = vmul.f32 %v1004_v10, %v794_v13 }
 0x350   :  { %v796_v18 = vadd.f32 %v1004_v10, %v795_v15 }
 0x351   :  { %v1006_v19 = vpop.eup %1005 }
 0x352   :  { %v800_v21 = vsel %vm799_vm14, %v1004_v10, %v796_v18  ;;  %v852_v22 = vmul.f32 %v1006_v19, %v850_v12  ;;  %vm857_vm0 = vweird.f32 %v1006_v19  ;;  %v1008_v36 = vpop.eup %1007 }
 0x353   :  { %v805_v23 = vsel %vm802_vm15, %v804_v20, %v800_v21  ;;  %vm858_vm4 = vmor %vm856_vm3, %vm857_vm0  ;;  %v920_v37 = vmul.f32 8.0, %v1008_v36  ;;  %vm924_vm6 = vweird.f32 %v1008_v36 }
 0x354   :  { %v853_v24 = vsub.f32 1.0, %v852_v22  ;;  %v806_v25 = vmul.f32 %v1000_v4, %v805_v23 }
 0x355   :  { %v921_v41 = vsub.f32 1.0, %v920_v37 }
 0x356   :  { %v854_v27 = vmul.f32 %v1006_v19, %v853_v24  ;;  %988 = vmatmul.msk.f32.vlgmr.msrb.gmra.mxu2 %vm782_vm11, %v806_v25 }
 0x357   :  { %v922_v44 = vmul.f32 %v1008_v36, %v921_v41 }
 0x358   :  { %v855_v29 = vadd.f32 %v1006_v19, %v854_v27 }
 0x359   :  { %v923_v47 = vadd.f32 %v1008_v36, %v922_v44 }
 0x35a   :  { %v859_v31 = vsel %vm858_vm4, %v1006_v19, %v855_v29 }
 0x35b   :  { %v864_v32 = vsel %vm861_vm5, %v863_v30, %v859_v31  ;;  %v925_v50 = vsel %vm924_vm6, %v1008_v36, %v923_v47 }
 0x35c   :  { %v865_v33 = vmul.f32 %v1002_v7, %v864_v32 }
 0x35e   :  { %987 = vmatmul.msk.f32.vlgmr.msrb.gmra.mxu1 %vm782_vm11, %v865_v33 }
 0x3d9   :  { %v909_v38 = vpop.f32.mrf.mxu2 }
 0x3db   :  { %v886_v39 = vpop.f32.mrf.mxu1 }
 0x3dc   :  { %v910_v40 = vadd.f32 %v909_v38, %v886_v39 }
 0x3de   :  { %v912_v42 = vsel %vm666_vm2, %v910_v40, 0.0 }
 0x3df   :  { %v913_v43 = vrot.slane %v912_v42, 4 }
 0x3e1   :  { %v914_v45 = vadd.f32 %v913_v43, %v912_v42 }
 0x3e3   :  { %v915_v46 = vrot.slane %v914_v45, 2 }
 0x3e5   :  { %v916_v48 = vadd.f32 %v915_v46, %v914_v45 }
 0x3e7   :  { %v917_v49 = vrot.slane %v916_v48, 1 }
 0x3e9   :  { %v918_v51 = vadd.f32 %v917_v49, %v916_v48 }
 0x3eb   :  { %v926_v52 = vmul.f32 %v925_v50, %v918_v51 }
 0x3ed   :  { %990 = vmatmul.msk.f32.vlgmr.msrb.gmra.mxu3 %vm666_vm2, %v926_v52 }
 0x470   :  { %v953_v54 = vpop.f32.mrf.mxu3 }
 0x471   :  { %v954_v55 = vadd.f32 %v953_v54, %v928_v53 }
 0x473   :  { %957 = vst.msk [vmem:[#allocation2] sm:$0x1] %vm956_vm1, %v954_v55 }
 0x474   :  { %968 = dma.vmem_to_hbm [thread:$0]  %s964_s26, 16, %s966_s29, [#allocation3]  }
 0x475   :  { %1033 = dma.done.wait [#allocation3], 16  }
 0x476   :  { %1034 = vsyncadd [#allocation3], 4294967280 }
 0x477   :  { %973 = vsyncpa [#allocation3], 1 }

</bundles_post_ra>
